<compile_context>
chip_gen: v7x
topology: tpu7x:2x2x1
jax: 0.10.0
libtpu: 0.0.40
codegen_flags: <defaults>
</compile_context>

<pallas_src>
import jax
import jax.numpy as jnp
from jax.experimental import pallas as pl
from jax.experimental.pallas import tpu as pltpu

DROP_P = 0.3
_KEEP_SCALE = 1.0 / (1.0 - DROP_P)
# drop iff full 32-bit draw < round(p * 2^32)  (unsigned compare)
_DROP_THRESHOLD_32 = int(round(DROP_P * (1 << 32)))
_GOLDEN = 0x9E3779B9
_REMIX_ADD = 0x6A09E667

MAX_BLOCK_ROWS = 2048            # (2048, 512) f32 = 4 MiB per block buffer
VMEM_LIMIT_BYTES = 32 * 1024 * 1024


def _hash32(x):
    """lowbias32 integer hash - pure uint32 VPU ops."""
    x = x ^ (x >> 16)
    x = x * jnp.uint32(0x7FEB352D)
    x = x ^ (x >> 15)
    x = x * jnp.uint32(0x846CA68B)
    x = x ^ (x >> 16)
    return x


def _model_kernel(seed_ref, x_ref, o_ref):
    br, lanes = x_ref.shape
    seed = seed_ref[0].astype(jnp.uint32)

    # Global flat element index, computed entirely in uint32 (wrap-safe).
    row = jax.lax.broadcasted_iota(jnp.int32, (br, lanes), 0).astype(jnp.uint32)
    col = jax.lax.broadcasted_iota(jnp.int32, (br, lanes), 1).astype(jnp.uint32)
    base = pl.program_id(0).astype(jnp.uint32) * jnp.uint32(br * lanes)
    idx = row * jnp.uint32(lanes) + col + base

    # One full hash per element; second draw via cheap LCG remix (2 ops).
    bits = _hash32(idx ^ seed)
    bits2 = bits * jnp.uint32(_GOLDEN) + jnp.uint32(_REMIX_ADD)

    # Dropout keep-mask: full-width unsigned compare, no shift.
    keep = bits >= jnp.uint32(_DROP_THRESHOLD_32)

    # rand_like: uniform [0, 1) from the top 24 bits of the remixed draw.
    u_rand = (bits2 >> 8).astype(jnp.int32).astype(jnp.float32) * jnp.float32(
        1.0 / (1 << 24)
    )

    # Native-dtype load, in-register upcast.
    x = x_ref[...].astype(jnp.float32)
    # Fused: where(keep, x/(1-p), 0) + 1  ==  where(keep, x*scale + 1, 1)
    x2 = jnp.where(keep, x * jnp.float32(_KEEP_SCALE) + jnp.float32(1.0),
                   jnp.float32(1.0))
    o_ref[...] = x2 * u_rand


def _round_up(a, b):
    return (a + b - 1) // b * b


def model_forward(x, seed: int):
    orig_shape = x.shape
    n = x.size

    # Fast path: pick the widest lane dim that divides n exactly -> free reshape,
    # no padding copy, no output slice.
    lanes = None
    for cand in (512, 256, 128):
        if n >= cand and n % cand == 0:
            lanes = cand
            break

    if lanes is not None:
        rows = n // lanes
        x2d = x.reshape(rows, lanes)
        padded_n = n
    else:
        # Ragged size: single pad copy up to a lane multiple (rows rounded to 16
        # so the tiny-case block is exact).
        lanes = 512 if n >= 512 else 128
        rows = _round_up(-(-n // lanes), 16)
        padded_n = rows * lanes
        x2d = jnp.pad(x.reshape(-1), (0, padded_n - n)).reshape(rows, lanes)

    if rows <= 16:
        block_rows = rows                       # "equal full dim" escape hatch
    else:
        block_rows = min(MAX_BLOCK_ROWS, _round_up(rows, 16))
    grid = (pl.cdiv(rows, block_rows),)

    seed_arr = jnp.asarray([seed], dtype=jnp.int32)

    out2d = pl.pallas_call(
        _model_kernel,
        out_shape=jax.ShapeDtypeStruct((rows, lanes), jnp.float32),
        grid=grid,
        in_specs=[
            pl.BlockSpec(memory_space=pltpu.MemorySpace.SMEM),      # seed scalar
            pl.BlockSpec((block_rows, lanes), lambda i: (i, 0)),    # input tile
        ],
        out_specs=pl.BlockSpec((block_rows, lanes), lambda i: (i, 0)),
        compiler_params=pltpu.CompilerParams(
            dimension_semantics=("parallel",),
            vmem_limit_bytes=VMEM_LIMIT_BYTES,
        ),
    )(seed_arr, x2d)

    out_flat = out2d.reshape(-1)
    if padded_n != n:
        out_flat = out_flat[:n]
    return out_flat.reshape(orig_shape)


if __name__ == "__main__":
    key = jax.random.PRNGKey(0)

    # Same shape as the PyTorch example input: (1, 2, 2)  (ragged/pad path).
    x_small = jax.random.normal(key, (1, 2, 2), dtype=jnp.float32)
    out_small = jax.block_until_ready(model_forward(x_small, seed=1234))
    assert out_small.shape == x_small.shape
    assert out_small.dtype == jnp.float32
    assert bool(jnp.all(jnp.isfinite(out_small)))
    # Envelope: |out| <= (|x|/(1-p) + 1) * 1 elementwise (rand in [0,1)).
    assert bool(jnp.all(jnp.abs(out_small) <=
                        jnp.abs(x_small) / (1.0 - DROP_P) + 1.0 + 1e-5))

    # Modest f32 shape exercising the no-copy fast path (2048 elems -> 512 lanes).
    x_med = jax.random.normal(jax.random.PRNGKey(1), (2, 4, 16, 16), dtype=jnp.float32)
    out_med = jax.block_until_ready(model_forward(x_med, seed=42))
    assert out_med.shape == x_med.shape
    assert bool(jnp.all(jnp.isfinite(out_med)))
    assert bool(jnp.all(jnp.abs(out_med) <=
                        jnp.abs(x_med) / (1.0 - DROP_P) + 1.0 + 1e-5))

    # bf16 input exercising the in-kernel upcast path (exact tiling).
    x_bf16 = jax.random.normal(jax.random.PRNGKey(2), (8, 64, 128), dtype=jnp.bfloat16)
    out_bf16 = jax.block_until_ready(model_forward(x_bf16, seed=7))
    assert out_bf16.shape == x_bf16.shape
    assert out_bf16.dtype == jnp.float32
    assert bool(jnp.all(jnp.isfinite(out_bf16)))

    print("KERNEL_OK")
</pallas_src>

<mosaic_0001>
module attributes {stable_mosaic.version = 11 : i64} {
  func.func @_model_kernel(%arg0: i32, %arg1: memref<1xi32, #tpu.memory_space<smem>>, %arg2: memref<16x128xf32, #tpu.memory_space<vmem>>, %arg3: memref<16x128xf32, #tpu.memory_space<vmem>>) attributes {dimension_semantics = [#tpu.dimension_semantics<parallel>], iteration_bounds = array<i64: 1>, scalar_prefetch = 0 : i64, scratch_operands = 0 : i64, tpu.core_type = #tpu.core_type<tc>, window_params = [{transform_indices = @transform_0, window_bounds = array<i64: 1>}, {transform_indices = @transform_1, window_bounds = array<i64: 16, 128>}, {transform_indices = @transform_2, window_bounds = array<i64: 16, 128>}]} {
    %c0 = arith.constant 0 : index
    %0 = memref.load %arg1[%c0] : memref<1xi32, #tpu.memory_space<smem>>
    %1 = tpu.iota {dimensions = array<i32: 0>} : vector<16x128xi32>
    %2 = tpu.iota {dimensions = array<i32: 1>} : vector<16x128xi32>
    %c2048_i32 = arith.constant 2048 : i32
    %3 = arith.muli %arg0, %c2048_i32 : i32
    %c128_i32 = arith.constant 128 : i32
    %4 = vector.broadcast %c128_i32 : i32 to vector<16x128xi32>
    %5 = arith.muli %1, %4 : vector<16x128xi32>
    %6 = arith.addi %5, %2 : vector<16x128xi32>
    %7 = vector.broadcast %3 : i32 to vector<16x128xi32>
    %8 = arith.addi %6, %7 : vector<16x128xi32>
    %9 = vector.broadcast %0 : i32 to vector<16x128xi32>
    %10 = arith.xori %8, %9 : vector<16x128xi32>
    %c16_i32 = arith.constant 16 : i32
    %11 = vector.broadcast %c16_i32 : i32 to vector<16x128xi32>
    %12 = arith.shrui %10, %11 : vector<16x128xi32>
    %13 = arith.xori %10, %12 : vector<16x128xi32>
    %c2146121005_i32 = arith.constant 2146121005 : i32
    %14 = vector.broadcast %c2146121005_i32 : i32 to vector<16x128xi32>
    %15 = arith.muli %13, %14 : vector<16x128xi32>
    %c15_i32 = arith.constant 15 : i32
    %16 = vector.broadcast %c15_i32 : i32 to vector<16x128xi32>
    %17 = arith.shrui %15, %16 : vector<16x128xi32>
    %18 = arith.xori %15, %17 : vector<16x128xi32>
    %c-2073254261_i32 = arith.constant -2073254261 : i32
    %19 = vector.broadcast %c-2073254261_i32 : i32 to vector<16x128xi32>
    %20 = arith.muli %18, %19 : vector<16x128xi32>
    %c16_i32_0 = arith.constant 16 : i32
    %21 = vector.broadcast %c16_i32_0 : i32 to vector<16x128xi32>
    %22 = arith.shrui %20, %21 : vector<16x128xi32>
    %23 = arith.xori %20, %22 : vector<16x128xi32>
    %c-1640531527_i32 = arith.constant -1640531527 : i32
    %24 = vector.broadcast %c-1640531527_i32 : i32 to vector<16x128xi32>
    %25 = arith.muli %23, %24 : vector<16x128xi32>
    %c1779033703_i32 = arith.constant 1779033703 : i32
    %26 = vector.broadcast %c1779033703_i32 : i32 to vector<16x128xi32>
    %27 = arith.addi %25, %26 : vector<16x128xi32>
    %c1288490189_i32 = arith.constant 1288490189 : i32
    %28 = vector.broadcast %c1288490189_i32 : i32 to vector<16x128xi32>
    %29 = arith.cmpi uge, %23, %28 : vector<16x128xi32>
    %c8_i32 = arith.constant 8 : i32
    %30 = vector.broadcast %c8_i32 : i32 to vector<16x128xi32>
    %31 = arith.shrui %27, %30 : vector<16x128xi32>
    %32 = arith.sitofp %31 : vector<16x128xi32> to vector<16x128xf32>
    %cst = arith.constant 5.96046448E-8 : f32
    %33 = vector.broadcast %cst : f32 to vector<16x128xf32>
    %34 = arith.mulf %32, %33 : vector<16x128xf32>
    %c0_1 = arith.constant 0 : index
    %c0_2 = arith.constant 0 : index
    %35 = vector.load %arg2[%c0_1, %c0_2] : memref<16x128xf32, #tpu.memory_space<vmem>>, vector<16x128xf32>
    %cst_3 = arith.constant 1.42857146 : f32
    %36 = vector.broadcast %cst_3 : f32 to vector<16x128xf32>
    %37 = arith.mulf %35, %36 : vector<16x128xf32>
    %cst_4 = arith.constant 1.000000e+00 : f32
    %38 = vector.broadcast %cst_4 : f32 to vector<16x128xf32>
    %39 = arith.addf %37, %38 : vector<16x128xf32>
    %cst_5 = arith.constant 1.000000e+00 : f32
    %40 = vector.broadcast %cst_5 : f32 to vector<16x128xf32>
    %41 = arith.select %29, %39, %40 : vector<16x128xi1>, vector<16x128xf32>
    %42 = arith.mulf %41, %34 : vector<16x128xf32>
    %c0_6 = arith.constant 0 : index
    %c0_7 = arith.constant 0 : index
    %43 = vector.load %arg3[%c0_6, %c0_7] : memref<16x128xf32, #tpu.memory_space<vmem>>, vector<16x128xf32>
    tpu.vector_store %arg3[%c0_6, %c0_7], %42 {strides = array<i32>} : memref<16x128xf32, #tpu.memory_space<vmem>>, vector<16x128xf32>,
    return
  }
  func.func @transform_0(%arg0: i32) -> i32 {
    %c0_i32 = arith.constant 0 : i32
    %c0_i32_0 = arith.constant 0 : i32
    return %c0_i32 : i32
  }
  func.func @transform_1(%arg0: i32) -> (i32, i32) {
    %c0_i32 = arith.constant 0 : i32
    %c0_i32_0 = arith.constant 0 : i32
    return %arg0, %c0_i32 : i32, i32
  }
  func.func @transform_2(%arg0: i32) -> (i32, i32) {
    %c0_i32 = arith.constant 0 : i32
    %c0_i32_0 = arith.constant 0 : i32
    return %arg0, %c0_i32 : i32, i32
  }
}

</mosaic_0001>

<bundles_post_ra>
// kernel: tpu_custom_call.1
= control target key start
LH: loop header
LB: loop body
LE: loop exit
PB: predicated region body
PF: predicated region fallthrough
CT: control target
= control target key end

     0   :  { %8 = vsyncpa [#allocation4], 0  ;;  %s205_s0 = inlined_call_operand.<no memory space> [shape: s32[1], index: 0, kind: input, shape index: {}]   ;;  %s206_s1 = inlined_call_operand.hbm [shape: f32[16,128], index: 1, kind: input, shape index: {}]   ;;  %s207_s2 = inlined_call_operand.hbm [shape: f32[16,128], index: 2, kind: output, shape index: {}]  }
   0x1   :  { %9 = vsyncpa [#allocation5], 0  ;;  %s153_s9 = smov [#allocation3]   ;;  %s105_s13 = scalar_lea.hbm %s206_s1, 256 }
   0x2   :  { %s17_s10 = sshll.u32 %s153_s9, 4  ;;  %p106_p0 = scmp.ne.s32.totalorder %s206_s1, %s105_s13  ;;  %s18_s10 = int_to_ptr.vmem [resolvable:$true] %s17_s10 }
   0x3   :  { %p109_p1 = scmp.lt.u32.totalorder %s105_s13, %s206_s1 }
   0x5   :  { %p111_p2 = pnand %p109_p1, %p106_p0 }
   0x7   :  { %114 = shalt.err (!%p111_p2)
}
   0x8   :  { %s115_s18 = scalar_lea.vmem %s18_s10, 256  ;;  %p120_p4 = scmp.lt.s32.totalorder %s18_s10, %s18_s10 }
   0x9   :  { %p116_p3 = scmp.ne.s32.totalorder %s18_s10, %s115_s18  ;;  %p121_p5 = scmp.lt.s32.totalorder %s115_s18, %s115_s18 }
   0xb   :  { %p122_p6 = por %p121_p5, %p120_p4 }
   0xd   :  { %p123_p7 = pnand %p122_p6, %p116_p3 }
   0xf   :  { %126 = shalt.err (!%p123_p7)
}
  0x10   :  { %s154_s19 = smov 128   ;;  %s155_s20 = smov 8  }
  0x11   :  { %23 = dma.hbm_to_vmem [thread:$0]  %s206_s1, 256, %s18_s10, [#allocation4], %s154_s19, %s154_s19, %s155_s20  }
  0x12   :  { %149 = dma.done.wait [#allocation4], 256  }
  0x13   :  { %150 = vsyncadd [#allocation4], 4294967040  ;;  %v28_v0 = vlaneseq  ;;  %v41_v5 = vstv %s205_s0  ;;  %v72_v23 = vld [vmem:[#allocation3] sm:$0xff]  ;;  %v73_v27 = vld [vmem:[#allocation3 + $0x8] sm:$0xff]  ;;  %s156_s0 = smov [#allocation6]  }
  0x14   :  { %v74_v28 = vmul.f32 1.4285715, %v72_v23  ;;  %v75_v31 = vmul.f32 1.4285715, %v73_v27  ;;  %s89_s1 = sshll.u32 %s156_s0, 4  ;;  %s90_s1 = int_to_ptr.vmem [resolvable:$true] %s89_s1 }
  0x15   :  { %v29_v1 = vshrl.u32 %v28_v0, 7  ;;  %v32_v2 = vand.u32 127, %v28_v0  ;;  %s127_s25 = scalar_lea.vmem %s90_s1, 256  ;;  %p132_p9 = scmp.lt.s32.totalorder %s90_s1, %s90_s1 }
  0x16   :  { %v76_v34 = vadd.f32 1.0, %v74_v28  ;;  %v77_v37 = vadd.f32 1.0, %v75_v31  ;;  %p128_p8 = scmp.ne.s32.totalorder %s90_s1, %s127_s25  ;;  %p133_p10 = scmp.lt.s32.totalorder %s127_s25, %s127_s25 }
  0x17   :  { %v34_v3 = vmul.u32 128, %v29_v1  ;;  %v30_v4 = vadd.s32 8, %v29_v1 }
  0x18   :  { %p134_p11 = por %p133_p10, %p132_p9 }
  0x19   :  { %v36_v6 = vadd.s32 %v34_v3, %v32_v2  ;;  %v35_v7 = vmul.u32 128, %v30_v4 }
  0x1a   :  { %p135_p12 = pnand %p134_p11, %p128_p8 }
  0x1b   :  { %v42_v8 = vxor.u32 %v41_v5, %v36_v6  ;;  %v37_v9 = vadd.s32 %v35_v7, %v32_v2 }
  0x1d   :  { %v44_v10 = vshrl.u32 %v42_v8, 16  ;;  %v43_v11 = vxor.u32 %v41_v5, %v37_v9 }
  0x1f   :  { %v46_v12 = vxor.u32 %v44_v10, %v42_v8  ;;  %v45_v13 = vshrl.u32 %v43_v11, 16 }
  0x21   :  { %v48_v14 = vmul.u32 2146121005, %v46_v12  ;;  %v47_v15 = vxor.u32 %v45_v13, %v43_v11 }
  0x23   :  { %v50_v16 = vshrl.u32 %v48_v14, 15  ;;  %v49_v17 = vmul.u32 2146121005, %v47_v15 }
  0x25   :  { %v52_v18 = vxor.u32 %v50_v16, %v48_v14  ;;  %v51_v19 = vshrl.u32 %v49_v17, 15 }
  0x27   :  { %v54_v20 = vmul.u32 2221713035, %v52_v18  ;;  %v53_v21 = vxor.u32 %v51_v19, %v49_v17 }
  0x29   :  { %v56_v22 = vshrl.u32 %v54_v20, 16  ;;  %v55_v24 = vmul.u32 2221713035, %v53_v21 }
  0x2b   :  { %v58_v25 = vxor.u32 %v56_v22, %v54_v20  ;;  %v57_v26 = vshrl.u32 %v55_v24, 16 }
  0x2d   :  { %v60_v29 = vmul.u32 2654435769, %v58_v25  ;;  %v59_v30 = vxor.u32 %v57_v26, %v55_v24  ;;  %vm64_vm0 = vcmp.ge.u32.totalorder %v58_v25, 1288490189 }
  0x2e   :  { %v78_v40 = vsel %vm64_vm0, %v76_v34, 1.0 }
  0x2f   :  { %v62_v32 = vadd.s32 1779033703, %v60_v29  ;;  %v61_v33 = vmul.u32 2654435769, %v59_v30  ;;  %vm65_vm1 = vcmp.ge.u32.totalorder %v59_v30, 1288490189 }
  0x30   :  { %v79_v43 = vsel %vm65_vm1, %v77_v37, 1.0 }
  0x31   :  { %v66_v35 = vshrl.u32 %v62_v32, 8  ;;  %v63_v36 = vadd.s32 1779033703, %v61_v33 }
  0x33   :  { %v68_v38 = vcvt.s32.f32 %v66_v35  ;;  %v67_v39 = vshrl.u32 %v63_v36, 8 }
  0x35   :  { %v70_v41 = vmul.f32 5.9604645e-08, %v68_v38  ;;  %v69_v42 = vcvt.s32.f32 %v67_v39 }
  0x37   :  { %v80_v44 = vmul.f32 %v78_v40, %v70_v41  ;;  %v71_v45 = vmul.f32 5.9604645e-08, %v69_v42 }
  0x39   :  { %82 = vst [vmem:[#allocation6] sm:$0xff] %v80_v44  ;;  %v81_v46 = vmul.f32 %v79_v43, %v71_v45 }
  0x3b   :  { %83 = vst [vmem:[#allocation6 + $0x8] sm:$0xff] %v81_v46 }
  0x3c   :  { %138 = shalt.err (!%p135_p12)
}
  0x3d   :  { %s139_s28 = scalar_lea.hbm %s207_s2, 256 }
  0x3e   :  { %p140_p13 = scmp.ne.s32.totalorder %s207_s2, %s139_s28  ;;  %p143_p0 = scmp.lt.u32.totalorder %s139_s28, %s207_s2 }
  0x40   :  { %p145_p1 = pnand %p143_p0, %p140_p13 }
  0x42   :  { %148 = shalt.err (!%p145_p1)
}
  0x43   :  { %95 = dma.vmem_to_hbm [thread:$0]  %s90_s1, 256, %s207_s2, [#allocation5], %s154_s19, %s154_s19, %s155_s20  }
  0x44   :  { %151 = dma.done.wait [#allocation5], 256  }
  0x45   :  { %152 = vsyncadd [#allocation5], 4294967040 }
  0x46   :  { %99 = vsyncpa [#allocation4], 1 }
  0x47   :  { %100 = vsyncpa [#allocation5], 1 }

</bundles_post_ra>
